<compile_context>
chip_gen: v7x
topology: tpu7x:2x2x1
jax: 0.10.0
libtpu: 0.0.40
codegen_flags: <defaults>
</compile_context>

<pallas_src>
import functools

import jax
import jax.numpy as jnp
from jax import lax
from jax.experimental import pallas as pl
from jax.experimental.pallas import tpu as pltpu

EPS = 1e-12  # F.normalize eps


# ---------------------------------------------------------------- helpers ---
def _l2norm_cols(x):
    # normalize each column (= each batch row in the transposed layout)
    ss = jnp.sum(x * x, axis=0, keepdims=True)             # (1, bn) sublane reduce
    return x * lax.rsqrt(jnp.maximum(ss, EPS * EPS))        # one EUP rsqrt, no divide


# ----------------------------------------------------------------- kernel ---
def transh_kernel(e1_ref, e2_ref, dr_ref, nr_ref, out_ref, *, l2_norm):
    e1 = e1_ref[...]          # (D, bn)
    e2 = e2_ref[...]
    d_r = dr_ref[...]
    n_r = nr_ref[...]

    if l2_norm:
        e1 = _l2norm_cols(e1)
        e2 = _l2norm_cols(e2)
        d_r = _l2norm_cols(d_r)

    # Fused hyperplane projection of the difference:
    #   e1_ + d_r - e2_ = (e1 - e2 + d_r) - c * n_r
    # with c = <e1 - e2, n_r> (divided by max(||n_r||, eps)^2 when n_r is
    # normalized, since projecting onto n_r/||n_r|| twice folds into 1/||n_r||^2).
    em = e1 - e2
    c = jnp.sum(em * n_r, axis=0, keepdims=True)            # (1, bn)
    if l2_norm:
        ss_n = jnp.sum(n_r * n_r, axis=0, keepdims=True)
        c = c / jnp.maximum(ss_n, EPS * EPS)

    diff = (em + d_r) - c * n_r
    # lane-dense (1, bn) store of the per-row negative L2 norm
    out_ref[...] = -jnp.sqrt(jnp.sum(diff * diff, axis=0, keepdims=True))


# ---------------------------------------------------------------- wrapper ---
def transh(e1, r, e2, *, p=2, feat_drop=0.0, l2_norm=True, block_n=256):
    """Pallas TransH forward.  e1, e2: (N, D); r: (N, 2D).  Returns (N,)."""
    assert p == 2, "only p=2 (L2 distance) is implemented"
    assert block_n % 128 == 0, "block_n must be a multiple of 128 (lane tile)"
    # TODO(synk): feat_drop is compiled out (eval-mode dropout == identity).
    del feat_drop

    N, D = e1.shape
    assert r.shape == (N, 2 * D)

    # Split r into its two halves and present all tensors transposed
    # (feature dim on sublanes, batch rows on lanes).
    d_r, n_r = r[:, :D], r[:, D:]
    npad = block_n * pl.cdiv(N, block_n) - N

    def prep(x):
        xt = jnp.asarray(x, jnp.float32).T                   # (D, N)
        return jnp.pad(xt, ((0, 0), (0, npad))) if npad else xt

    e1t, e2t, drt, nrt = prep(e1), prep(e2), prep(d_r), prep(n_r)
    n_padded = N + npad

    in_spec = pl.BlockSpec((D, block_n), lambda i: (0, i))
    out = pl.pallas_call(
        functools.partial(transh_kernel, l2_norm=l2_norm),
        out_shape=jax.ShapeDtypeStruct((1, n_padded), jnp.float32),
        grid=(n_padded // block_n,),
        in_specs=[in_spec, in_spec, in_spec, in_spec],
        out_specs=pl.BlockSpec((1, block_n), lambda i: (0, i)),
        compiler_params=pltpu.CompilerParams(
            dimension_semantics=("parallel",)),
    )(e1t, e2t, drt, nrt)
    return out[0, :N]


# ------------------------------------------------------- pure-JAX reference -
def ref_transh(e1, r, e2, *, l2_norm=True):
    def norm(x):
        n = jnp.linalg.norm(x, axis=1, keepdims=True)
        return x / jnp.maximum(n, EPS)

    D = e1.shape[1]
    if l2_norm:
        e1 = norm(e1)
        e2 = norm(e2)
    d_r, n_r = r[:, :D], r[:, D:]
    if l2_norm:
        d_r = norm(d_r)
        n_r = norm(n_r)
    e1_ = e1 - jnp.sum(e1 * n_r, axis=1, keepdims=True) * n_r
    e2_ = e2 - jnp.sum(e2 * n_r, axis=1, keepdims=True) * n_r
    return -jnp.linalg.norm(e1_ + d_r - e2_, axis=1)


# -------------------------------------------------------------------- main --
if __name__ == "__main__":
    # N deliberately not a multiple of block_n (exercises pad/cdiv path) and
    # large enough that the padded grid has 2 steps (both TensorCores get work).
    N, D = 300, 32
    key = jax.random.PRNGKey(0)
    k1, k2, k3 = jax.random.split(key, 3)
    e1 = jax.random.normal(k1, (N, D), jnp.float32)
    r = jax.random.normal(k2, (N, 2 * D), jnp.float32)
    e2 = jax.random.normal(k3, (N, D), jnp.float32)

    out = jax.block_until_ready(transh(e1, r, e2, l2_norm=True, block_n=256))
    out_nonorm = jax.block_until_ready(transh(e1, r, e2, l2_norm=False, block_n=256))

    ref = ref_transh(e1, r, e2, l2_norm=True)
    ref_nonorm = ref_transh(e1, r, e2, l2_norm=False)

    assert out.shape == (N,) and out_nonorm.shape == (N,)
    assert jnp.allclose(out, ref, atol=1e-4, rtol=1e-4), \
        float(jnp.max(jnp.abs(out - ref)))
    assert jnp.allclose(out_nonorm, ref_nonorm, atol=1e-4, rtol=1e-4), \
        float(jnp.max(jnp.abs(out_nonorm - ref_nonorm)))

    print("KERNEL_OK")
</pallas_src>

<mosaic_0001>
module attributes {stable_mosaic.version = 11 : i64} {
  func.func @transh_kernel(%arg0: i32, %arg1: memref<32x256xf32, #tpu.memory_space<vmem>>, %arg2: memref<32x256xf32, #tpu.memory_space<vmem>>, %arg3: memref<32x256xf32, #tpu.memory_space<vmem>>, %arg4: memref<32x256xf32, #tpu.memory_space<vmem>>, %arg5: memref<1x256xf32, #tpu.memory_space<vmem>>) attributes {dimension_semantics = [#tpu.dimension_semantics<parallel>], iteration_bounds = array<i64: 2>, scalar_prefetch = 0 : i64, scratch_operands = 0 : i64, tpu.core_type = #tpu.core_type<tc>, window_params = [{transform_indices = @transform_0, window_bounds = array<i64: 32, 256>}, {transform_indices = @transform_1, window_bounds = array<i64: 32, 256>}, {transform_indices = @transform_2, window_bounds = array<i64: 32, 256>}, {transform_indices = @transform_3, window_bounds = array<i64: 32, 256>}, {transform_indices = @transform_4, window_bounds = array<i64: 1, 256>}]} {
    %c0 = arith.constant 0 : index
    %c0_0 = arith.constant 0 : index
    %0 = vector.load %arg1[%c0, %c0_0] : memref<32x256xf32, #tpu.memory_space<vmem>>, vector<32x256xf32>
    %c0_1 = arith.constant 0 : index
    %c0_2 = arith.constant 0 : index
    %1 = vector.load %arg2[%c0_1, %c0_2] : memref<32x256xf32, #tpu.memory_space<vmem>>, vector<32x256xf32>
    %c0_3 = arith.constant 0 : index
    %c0_4 = arith.constant 0 : index
    %2 = vector.load %arg3[%c0_3, %c0_4] : memref<32x256xf32, #tpu.memory_space<vmem>>, vector<32x256xf32>
    %c0_5 = arith.constant 0 : index
    %c0_6 = arith.constant 0 : index
    %3 = vector.load %arg4[%c0_5, %c0_6] : memref<32x256xf32, #tpu.memory_space<vmem>>, vector<32x256xf32>
    %4 = arith.mulf %0, %0 : vector<32x256xf32>
    %cst = arith.constant dense<0.000000e+00> : vector<256xf32>
    %5 = vector.multi_reduction <add>, %4, %cst [0] : vector<32x256xf32> to vector<256xf32>
    %6 = vector.shape_cast %5 : vector<256xf32> to vector<1x256xf32>
    %cst_7 = arith.constant 1.000000e-24 : f32
    %7 = vector.broadcast %cst_7 : f32 to vector<1x256xf32>
    %8 = arith.maximumf %6, %7 : vector<1x256xf32>
    %9 = math.rsqrt %8 : vector<1x256xf32>
    %10 = vector.broadcast %9 : vector<1x256xf32> to vector<32x256xf32>
    %11 = arith.mulf %0, %10 : vector<32x256xf32>
    %12 = arith.mulf %1, %1 : vector<32x256xf32>
    %cst_8 = arith.constant dense<0.000000e+00> : vector<256xf32>
    %13 = vector.multi_reduction <add>, %12, %cst_8 [0] : vector<32x256xf32> to vector<256xf32>
    %14 = vector.shape_cast %13 : vector<256xf32> to vector<1x256xf32>
    %cst_9 = arith.constant 1.000000e-24 : f32
    %15 = vector.broadcast %cst_9 : f32 to vector<1x256xf32>
    %16 = arith.maximumf %14, %15 : vector<1x256xf32>
    %17 = math.rsqrt %16 : vector<1x256xf32>
    %18 = vector.broadcast %17 : vector<1x256xf32> to vector<32x256xf32>
    %19 = arith.mulf %1, %18 : vector<32x256xf32>
    %20 = arith.mulf %2, %2 : vector<32x256xf32>
    %cst_10 = arith.constant dense<0.000000e+00> : vector<256xf32>
    %21 = vector.multi_reduction <add>, %20, %cst_10 [0] : vector<32x256xf32> to vector<256xf32>
    %22 = vector.shape_cast %21 : vector<256xf32> to vector<1x256xf32>
    %cst_11 = arith.constant 1.000000e-24 : f32
    %23 = vector.broadcast %cst_11 : f32 to vector<1x256xf32>
    %24 = arith.maximumf %22, %23 : vector<1x256xf32>
    %25 = math.rsqrt %24 : vector<1x256xf32>
    %26 = vector.broadcast %25 : vector<1x256xf32> to vector<32x256xf32>
    %27 = arith.mulf %2, %26 : vector<32x256xf32>
    %28 = arith.subf %11, %19 : vector<32x256xf32>
    %29 = arith.mulf %28, %3 : vector<32x256xf32>
    %cst_12 = arith.constant dense<0.000000e+00> : vector<256xf32>
    %30 = vector.multi_reduction <add>, %29, %cst_12 [0] : vector<32x256xf32> to vector<256xf32>
    %31 = vector.shape_cast %30 : vector<256xf32> to vector<1x256xf32>
    %32 = arith.mulf %3, %3 : vector<32x256xf32>
    %cst_13 = arith.constant dense<0.000000e+00> : vector<256xf32>
    %33 = vector.multi_reduction <add>, %32, %cst_13 [0] : vector<32x256xf32> to vector<256xf32>
    %34 = vector.shape_cast %33 : vector<256xf32> to vector<1x256xf32>
    %cst_14 = arith.constant 1.000000e-24 : f32
    %35 = vector.broadcast %cst_14 : f32 to vector<1x256xf32>
    %36 = arith.maximumf %34, %35 : vector<1x256xf32>
    %37 = arith.divf %31, %36 : vector<1x256xf32>
    %38 = arith.addf %28, %27 : vector<32x256xf32>
    %39 = vector.broadcast %37 : vector<1x256xf32> to vector<32x256xf32>
    %40 = arith.mulf %39, %3 : vector<32x256xf32>
    %41 = arith.subf %38, %40 : vector<32x256xf32>
    %42 = arith.mulf %41, %41 : vector<32x256xf32>
    %cst_15 = arith.constant dense<0.000000e+00> : vector<256xf32>
    %43 = vector.multi_reduction <add>, %42, %cst_15 [0] : vector<32x256xf32> to vector<256xf32>
    %44 = vector.shape_cast %43 : vector<256xf32> to vector<1x256xf32>
    %45 = math.sqrt %44 : vector<1x256xf32>
    %cst_16 = arith.constant 0.000000e+00 : f32
    %46 = vector.broadcast %cst_16 : f32 to vector<1x256xf32>
    %47 = arith.subf %46, %45 : vector<1x256xf32>
    %c0_17 = arith.constant 0 : index
    %c0_18 = arith.constant 0 : index
    %48 = vector.load %arg5[%c0_17, %c0_18] : memref<1x256xf32, #tpu.memory_space<vmem>>, vector<1x256xf32>
    tpu.vector_store %arg5[%c0_17, %c0_18], %47 {strides = array<i32>} : memref<1x256xf32, #tpu.memory_space<vmem>>, vector<1x256xf32>,
    return
  }
  func.func @transform_0(%arg0: i32) -> (i32, i32) {
    %c0_i32 = arith.constant 0 : i32
    %c0_i32_0 = arith.constant 0 : i32
    return %c0_i32, %arg0 : i32, i32
  }
  func.func @transform_1(%arg0: i32) -> (i32, i32) {
    %c0_i32 = arith.constant 0 : i32
    %c0_i32_0 = arith.constant 0 : i32
    return %c0_i32, %arg0 : i32, i32
  }
  func.func @transform_2(%arg0: i32) -> (i32, i32) {
    %c0_i32 = arith.constant 0 : i32
    %c0_i32_0 = arith.constant 0 : i32
    return %c0_i32, %arg0 : i32, i32
  }
  func.func @transform_3(%arg0: i32) -> (i32, i32) {
    %c0_i32 = arith.constant 0 : i32
    %c0_i32_0 = arith.constant 0 : i32
    return %c0_i32, %arg0 : i32, i32
  }
  func.func @transform_4(%arg0: i32) -> (i32, i32) {
    %c0_i32 = arith.constant 0 : i32
    %c0_i32_0 = arith.constant 0 : i32
    return %c0_i32, %arg0 : i32, i32
  }
}

</mosaic_0001>

<bundles_post_ra>
// kernel: tpu_custom_call.1
= control target key start
LH: loop header
LB: loop body
LE: loop exit
PB: predicated region body
PF: predicated region fallthrough
CT: control target
= control target key end

     0   :  { %s1630_s0 = inlined_call_operand.hbm [shape: f32[32,512], index: 0, kind: input, shape index: {}]   ;;  %s1631_s1 = inlined_call_operand.hbm [shape: f32[32,512], index: 1, kind: input, shape index: {}]   ;;  %s1632_s2 = inlined_call_operand.hbm [shape: f32[32,512], index: 2, kind: input, shape index: {}]   ;;  %s1633_s3 = inlined_call_operand.hbm [shape: f32[32,512], index: 3, kind: input, shape index: {}]   ;;  %s1634_s4 = inlined_call_operand.hbm [shape: f32[1,512], index: 4, kind: output, shape index: {}]  }
   0x1   :  { %1652 = sst [smem:[#allocation24_spill]] %s1630_s0 }
   0x2   :  { %1653 = sst [smem:[#allocation25_spill]] %s1631_s1 }
   0x3   :  { %9 = vsyncpa [#allocation3], 0 }
   0x4   :  { %11 = vsyncpa [#allocation3 + $0x1], 0 }
   0x5   :  { %12 = vsyncpa [#allocation6], 0 }
   0x6   :  { %14 = vsyncpa [#allocation6 + $0x1], 0 }
   0x7   :  { %15 = vsyncpa [#allocation9], 0 }
   0x8   :  { %17 = vsyncpa [#allocation9 + $0x1], 0 }
   0x9   :  { %18 = vsyncpa [#allocation4], 0 }
   0xa   :  { %20 = vsyncpa [#allocation4 + $0x1], 0  ;;  %s1136_s15 = smov 0   ;;  %s1138_s16 = smov 0  }
   0xb   :  { %s1140_s17 = smov 0   ;;  %s1142_s18 = smov 0  }
   0xc LB: > { %1654 = sst [smem:[#allocation15_spill]] %s1096_s17  ;;  %s1157_s19 = sadd.s32 4294967295, %s1100_s18   ;;  %s1100_s18 = sphi %s1142_s18, %s1687_s18   ;;  %s1096_s17 = sphi %s1140_s17, %s1689_s17   ;;  %s1092_s16 = sphi %s1138_s16, %s1691_s16   ;;  %s1088_s15 = sphi %s1136_s15, %s1690_s15  }
   0xd   : > { %1655 = sst [smem:[#allocation16_spill]] %s1100_s18  ;;  %s790_s20 = sadd.s32 4294967294, %s1100_s18  }
   0xe   : > { %s1161_s21 = sadd.s32 1, %s1100_s18   ;;  %s33_s22 = sadd.s32 1, %s1096_s17 }
   0xf   : > { %1656 = sst [smem:[#allocation17_spill]] %s1161_s21  ;;  %s30_s23 = ssub.s32 %s1100_s18, %s1161_s21 }
  0x10   : > { %p40_p0 = scmp.ne.s32.totalorder %s1096_s17, %s1092_s16  ;;  %p31_p1 = scmp.eq.s32.totalorder %s30_s23, 0 }
  0x11   : > { %p41_p2 = scmp.eq.s32.totalorder %s1100_s18, 0  ;;  %p46_p3 = scmp.ne.s32.totalorder %s1092_s16, %s1088_s15 }
  0x12   : > { %p47_p4 = scmp.eq.s32.totalorder %s1157_s19, 0  ;;  %p148_p7 = scmp.eq.s32.totalorder %s1157_s19, 1 }
  0x13   : > { %s1173_s24 = scalar_select %p31_p1, %s1096_s17, %s33_s22  }
  0x14   : > { %p42_p5 = por %p41_p2, %p40_p0  ;;  %p1175_p6 = por %p47_p4, %p46_p3 }
  0x15   : > { %1657 = sst [smem:[#allocation18_spill]] %s1173_s24  ;;  %p154_p8 = scmp.eq.s32.totalorder %s790_s20, 1 }
  0x16   : > { %s1658_s25 = scalar_select %p1175_p6, 1, 0 }
  0x17   : > { %p848_p10 = scmp.lt.s32.totalorder %s1100_s18, 2  ;;  %p1182_p11 = por %p148_p7, %p40_p0 }
  0x18   : > { %p1186_p12 = por %p154_p8, %p46_p3  ;;  %s1191_s28 = sand.u32 1, %s1096_s17  }
  0x19   : > { %s1659_s26 = scalar_select %p1182_p11, 1, 0 }
  0x1a   : > { %s1660_s27 = scalar_select %p1186_p12, 1, 0 }
  0x1b   : > { %s1194_s29 = sshll.u32 %s1100_s18, 8  ;;  %s1197_s30 = sshll.u32 %s1191_s28, 6 }
  0x1c   : > { %p1199_p13 = pnand %p848_p10, %p42_p5  ;;  %s195_s6 = sand.u32 1, %s1100_s18  }
  0x1d   : > { %s1662_s1 = sld [smem:[#allocation25_spill]]  ;;  %s199_s10 = scalar_lea.vmem [#allocation5], %s1197_s30 }
  0x1e   : > { %s206_s11 = sshll.u32 %s199_s10, 4  ;;  %s1215_s12 = scalar_lea.sflag [#allocation6], %s195_s6  ;;  %s1212_s11 = int_to_ptr.vmem [resolvable:$true] %s206_s11 }
  0x1f   : > { %p1221_p3 = pneg %p1199_p13 }
  0x23   : > { %s1208_s9 = scalar_lea.hbm %s1662_s1, %s1194_s29  ;;  %s911_s23 = scalar_lea.hbm %s1662_s1, 2048 }
  0x24   : > { %s906_s13 = scalar_lea.hbm %s1208_s9, 1024  ;;  %p912_p7 = scmp.lt.u32.totalorder %s1208_s9, %s1662_s1 }
  0x25   : > { %p907_p2 = scmp.ne.s32.totalorder %s1208_s9, %s906_s13  ;;  %p913_p8 = scmp.lt.u32.totalorder %s911_s23, %s906_s13 }
  0x26   : > { %p915_p9 = scmp.lt.u32.totalorder %s906_s13, %s1208_s9 }
  0x27   : > { %p909_p4 = pnand %p1221_p3, %p907_p2  ;;  %p914_p10 = por %p913_p8, %p912_p7 }
  0x29   : > { %p910_p5 = pneg %p909_p4  ;;  %p916_p0 = por %p915_p9, %p914_p10 }
  0x2b   : > { %p917_p1 = pnand %p916_p0, %p910_p5 }
  0x2d   : > { %920 = shalt.err (!%p917_p1)
}
  0x2e   : > { %s921_s6 = scalar_lea.vmem %s1212_s11, 1024  ;;  %s1102_s10 = smov [#allocation5]  }
  0x2f   : > { %p922_p2 = scmp.ne.s32.totalorder %s1212_s11, %s921_s6  ;;  %s926_s20 = sshll.u32 %s1102_s10, 4  ;;  %s927_s20 = int_to_ptr.vmem [resolvable:$false] %s926_s20 }
  0x30   : > { %s928_s22 = scalar_lea.vmem %s927_s20, 2048  ;;  %p929_p11 = scmp.lt.s32.totalorder %s1212_s11, %s927_s20 }
  0x31   : > { %p924_p4 = pnand %p922_p2, %p1221_p3  ;;  %p930_p6 = scmp.lt.s32.totalorder %s928_s22, %s921_s6 }
  0x33   : > { %p925_p12 = pneg %p924_p4  ;;  %p931_p7 = por %p930_p6, %p929_p11 }
  0x35   : > { %p932_p8 = pnand %p931_p7, %p925_p12 }
  0x37   : > { %935 = shalt.err (!%p932_p8)
}
  0x38   : > { %s1637_s13 = smov 512   ;;  %s1639_s23 = smov 256  }
  0x39   : > { %s1641_s7 = smov 16   ;;  %p1664_p6 = scmp.lt.s32.totalorder %s1100_s18, 3 }
  0x3a   : > { %837 = dma.hbm_to_vmem [thread:$0]  (!%p1199_p13), %s1208_s9, 1024, %s1212_s11, %s1215_s12, %s1637_s13, %s1639_s23, %s1641_s7  }
  0x3b   : > { %p1665_p9 = scmp.ge.s32.totalorder %s1100_s18, 1  ;;  %s1667_s0 = sld [smem:[#allocation24_spill]] }
  0x3c   : > { %s178_s22 = scalar_lea.vmem [#allocation2], %s1197_s30  ;;  %s1269_s13 = scalar_lea.hbm %s1632_s2, %s1194_s29 }
  0x3d   : > { %p1252_p11 = pnand %p1665_p9, %p1664_p6  ;;  %s185_s1 = sshll.u32 %s178_s22, 4  ;;  %s1263_s1 = int_to_ptr.vmem [resolvable:$true] %s185_s1 }
  0x3e   : > { %s175_s23 = scalar_lea.sflag [#allocation3], %s1191_s28 }
  0x3f   : > { %s1666_s8 = scalar_select %p1252_p11, 1, 0 }
  0x41   : > { %s1260_s20 = scalar_lea.hbm %s1667_s0, %s1194_s29  ;;  %s941_s24 = scalar_lea.hbm %s1667_s0, 2048 }
  0x42   : > { %s936_s7 = scalar_lea.hbm %s1260_s20, 1024  ;;  %p942_p5 = scmp.lt.u32.totalorder %s1260_s20, %s1667_s0 }
  0x43   : > { %p937_p12 = scmp.ne.s32.totalorder %s1260_s20, %s936_s7  ;;  %p943_p10 = scmp.lt.u32.totalorder %s941_s24, %s936_s7 }
  0x44   : > { %p945_p4 = scmp.lt.u32.totalorder %s936_s7, %s1260_s20 }
  0x45   : > { %p939_p0 = pnand %p937_p12, %p1221_p3  ;;  %p944_p2 = por %p943_p10, %p942_p5 }
  0x47   : > { %p940_p1 = pneg %p939_p0  ;;  %p946_p7 = por %p945_p4, %p944_p2 }
  0x49   : > { %p947_p8 = pnand %p946_p7, %p940_p1 }
  0x4b   : > { %950 = shalt.err (!%p947_p8)
}
  0x4c   : > { %s951_s22 = scalar_lea.vmem %s1263_s1, 1024  ;;  %s1106_s9 = smov [#allocation2]  }
  0x4d   : > { %p952_p6 = scmp.ne.s32.totalorder %s1263_s1, %s951_s22  ;;  %s956_s11 = sshll.u32 %s1106_s9, 4  ;;  %s957_s11 = int_to_ptr.vmem [resolvable:$false] %s956_s11 }
  0x4e   : > { %s958_s17 = scalar_lea.vmem %s957_s11, 2048  ;;  %p959_p0 = scmp.lt.s32.totalorder %s1263_s1, %s957_s11 }
  0x4f   : > { %p954_p9 = pnand %p952_p6, %p1221_p3  ;;  %p960_p11 = scmp.lt.s32.totalorder %s958_s17, %s951_s22 }
  0x51   : > { %p955_p12 = pneg %p954_p9  ;;  %p961_p5 = por %p960_p11, %p959_p0 }
  0x53   : > { %p962_p10 = pnand %p961_p5, %p955_p12 }
  0x55   : > { %965 = shalt.err (!%p962_p10)
}
  0x56   : > { %s1668_s21 = smov 16   ;;  %s1669_s24 = smov 256  }
  0x57   : > { %s1670_s7 = smov 512   ;;  %s220_s6 = scalar_lea.vmem [#allocation7], %s1197_s30 }
  0x58   : > { %834 = dma.hbm_to_vmem [thread:$0]  (!%p1199_p13), %s1260_s20, 1024, %s1263_s1, %s175_s23, %s1670_s7, %s1669_s24, %s1668_s21  }
  0x59   : > { %s227_s10 = sshll.u32 %s220_s6, 4  ;;  %s966_s22 = scalar_lea.hbm %s1269_s13, 1024  ;;  %s1299_s10 = int_to_ptr.vmem [resolvable:$true] %s227_s10 }
  0x5a   : > { %p967_p11 = scmp.ne.s32.totalorder %s1269_s13, %s966_s22  ;;  %s971_s17 = scalar_lea.hbm %s1632_s2, 2048 }
  0x5b   : > { %p972_p4 = scmp.lt.u32.totalorder %s1269_s13, %s1632_s2  ;;  %p973_p7 = scmp.lt.u32.totalorder %s971_s17, %s966_s22 }
  0x5c   : > { %p969_p1 = pnand %p967_p11, %p1221_p3  ;;  %p975_p6 = scmp.lt.u32.totalorder %s966_s22, %s1269_s13 }
  0x5d   : > { %p974_p8 = por %p973_p7, %p972_p4 }
  0x5e   : > { %p970_p2 = pneg %p969_p1 }
  0x5f   : > { %p976_p9 = por %p975_p6, %p974_p8 }
  0x61   : > { %p977_p12 = pnand %p976_p9, %p970_p2 }
  0x63   : > { %980 = shalt.err (!%p977_p12)
}
  0x64   : > { %s981_s1 = scalar_lea.vmem %s1299_s10, 1024  ;;  %s1107_s23 = smov [#allocation7]  }
  0x65   : > { %p982_p0 = scmp.ne.s32.totalorder %s1299_s10, %s981_s1  ;;  %s986_s20 = sshll.u32 %s1107_s23, 4  ;;  %s987_s20 = int_to_ptr.vmem [resolvable:$false] %s986_s20 }
  0x66   : > { %s988_s0 = scalar_lea.vmem %s987_s20, 2048  ;;  %p989_p11 = scmp.lt.s32.totalorder %s1299_s10, %s987_s20 }
  0x67   : > { %p984_p5 = pnand %p982_p0, %p1221_p3  ;;  %p990_p1 = scmp.lt.s32.totalorder %s988_s0, %s981_s1 }
  0x69   : > { %p985_p10 = pneg %p984_p5  ;;  %p991_p4 = por %p990_p1, %p989_p11 }
  0x6b   : > { %p992_p7 = pnand %p991_p4, %p985_p10 }
  0x6d   : > { %995 = shalt.err (!%p992_p7)
}
  0x6e   : > { %840 = dma.hbm_to_vmem [thread:$0]  (!%p1199_p13), %s1269_s13, 1024, %s1299_s10, %s1215_s12, %s1670_s7, %s1669_s24, %s1668_s21  }
  0x6f   : > { %s1330_s22 = scalar_lea.hbm %s1633_s3, %s1194_s29  ;;  %s241_s9 = scalar_lea.vmem [#allocation8], %s1197_s30 }
  0x70   : > { %s248_s11 = sshll.u32 %s241_s9, 4  ;;  %s238_s17 = scalar_lea.sflag [#allocation9], %s1191_s28  ;;  %s1333_s11 = int_to_ptr.vmem [resolvable:$true] %s248_s11 }
  0x71   : > { %s996_s1 = scalar_lea.hbm %s1330_s22, 1024  ;;  %s1001_s10 = scalar_lea.hbm %s1633_s3, 2048 }
  0x72   : > { %p997_p2 = scmp.ne.s32.totalorder %s1330_s22, %s996_s1  ;;  %p1002_p9 = scmp.lt.u32.totalorder %s1330_s22, %s1633_s3 }
  0x73   : > { %p1003_p12 = scmp.lt.u32.totalorder %s1001_s10, %s996_s1  ;;  %p1005_p5 = scmp.lt.u32.totalorder %s996_s1, %s1330_s22 }
  0x74   : > { %p999_p8 = pnand %p997_p2, %p1221_p3 }
  0x75   : > { %p1004_p0 = por %p1003_p12, %p1002_p9 }
  0x76   : > { %p1000_p6 = pneg %p999_p8 }
  0x77   : > { %p1006_p10 = por %p1005_p5, %p1004_p0 }
  0x79   : > { %p1007_p11 = pnand %p1006_p10, %p1000_p6 }
  0x7b   : > { %1010 = shalt.err (!%p1007_p11)
}
  0x7c   : > { %s1011_s30 = scalar_lea.vmem %s1333_s11, 1024  ;;  %s1108_s20 = smov [#allocation8]  }
  0x7d   : > { %p1012_p1 = scmp.ne.s32.totalorder %s1333_s11, %s1011_s30  ;;  %s1016_s0 = sshll.u32 %s1108_s20, 4  ;;  %s1017_s0 = int_to_ptr.vmem [resolvable:$false] %s1016_s0 }
  0x7e   : > { %s1018_s18 = scalar_lea.vmem %s1017_s0, 2048  ;;  %p1019_p2 = scmp.lt.s32.totalorder %s1333_s11, %s1017_s0 }
  0x7f   : > { %p1014_p4 = pnand %p1012_p1, %p1221_p3  ;;  %p1020_p8 = scmp.lt.s32.totalorder %s1018_s18, %s1011_s30 }
  0x81   : > { %p1015_p7 = pneg %p1014_p4  ;;  %p1021_p9 = por %p1020_p8, %p1019_p2 }
  0x83   : > { %p1022_p12 = pnand %p1021_p9, %p1015_p7 }
  0x85   : > { %1025 = shalt.err (!%p1022_p12)
}
  0x86   : > { %843 = dma.hbm_to_vmem [thread:$0]  (!%p1199_p13), %s1330_s22, 1024, %s1333_s11, %s238_s17, %s1670_s7, %s1669_s24, %s1668_s21  }
  0x87   : > { %p1671_p3 = scmp.ne.s32.totalorder %s1666_s8, 0 }
  0x89   : > { %260 = sbr.rel (%p1671_p3) target bundleno = 280 (0x118), region = 36 }
  0x90   : > { %s1365_s14 = sand.u32 1, %s1092_s16   ;;  %p1672_p6 = scmp.ne.s32.totalorder %s1658_s25, 0 }
  0x91   : > { %s806_s6 = sshll.u32 %s1365_s14, 6  ;;  %s263_s9 = scalar_lea.sflag [#allocation3], %s1365_s14 }
  0x92   : > { %s266_s5 = scalar_lea.vmem [#allocation2], %s806_s6 }
  0x93   : > { %1071 = dma.done.wait (%p1672_p6), %s263_s9, 1024  }
  0x94   : > { %1073 = vsyncadd (%p1672_p6), %s263_s9, 4294966272  ;;  %s271_s28 = sand.u32 1, %s1157_s19   ;;  %s1374_s8 = scalar_lea.vmem [#allocation5], %s806_s6 }
  0x95   : > { %s272_s21 = scalar_lea.sflag [#allocation6], %s271_s28 }
  0x96   : > { %1075 = dma.done.wait (%p1672_p6), %s272_s21, 2048  }
  0x97   : > { %1077 = vsyncadd (%p1672_p6), %s272_s21, 4294965248  ;;  %s1380_s24 = scalar_lea.vmem [#allocation7], %s806_s6  ;;  %s290_s7 = scalar_lea.sflag [#allocation9], %s1365_s14 }
  0x98   : > { %s1383_s22 = scalar_lea.vmem [#allocation8], %s806_s6 }
  0x99   : > { %1079 = dma.done.wait (%p1672_p6), %s290_s7, 1024  }
  0x9a   : > { %1081 = vsyncadd (%p1672_p6), %s290_s7, 4294966272  ;;  %v1389_v0 = vld [vmem:[%s266_s5] sm:$0xff]  ;;  %v1391_v1 = vld [vmem:[%s266_s5 + $0x8] sm:$0xff]  ;;  %s810_s25 = sshll.u32 %s1365_s14, 1  ;;  %s820_s11 = sshll.u32 %s1157_s19, 5 }
  0x9b   : > { %v1393_v2 = vld [vmem:[%s266_s5 + $0x10] sm:$0xff]  ;;  %v1395_v3 = vld [vmem:[%s266_s5 + $0x18] sm:$0xff]  ;;  %v1397_v4 = vld [vmem:[%s266_s5 + $0x20] sm:$0xff]  ;;  %v370_v6 = vmul.f32 %v1389_v0, %v1389_v0  ;;  %v371_v7 = vmul.f32 %v1391_v1, %v1391_v1  ;;  %s332_s17 = scalar_lea.vmem [#allocation10], %s810_s25  ;;  %s1586_s10 = scalar_lea.hbm %s1634_s4, %s820_s11 }
  0x9c   : > { %v1399_v5 = vld [vmem:[%s266_s5 + $0x28] sm:$0xff]  ;;  %v372_v8 = vmul.f32 %v1393_v2, %v1393_v2  ;;  %v1407_v9 = vld [vmem:[%s266_s5 + $0x30] sm:$0xff]  ;;  %v1409_v10 = vld [vmem:[%s266_s5 + $0x38] sm:$0xff]  ;;  %v373_v12 = vmul.f32 %v1395_v3, %v1395_v3  ;;  %v374_v13 = vmul.f32 %v1397_v4, %v1397_v4  ;;  %s654_s1 = sshll.u32 %s332_s17, 4  ;;  %s640_s29 = scalar_lea.sflag [#allocation4], %s1365_s14  ;;  %s1588_s1 = int_to_ptr.vmem [resolvable:$true] %s654_s1 }
  0x9d   : > { %v1412_v11 = vld [vmem:[%s1374_s8] sm:$0xff]  ;;  %v375_v14 = vmul.f32 %v1399_v5, %v1399_v5  ;;  %v1421_v15 = vld [vmem:[%s1374_s8 + $0x8] sm:$0xff]  ;;  %v1424_v16 = vld [vmem:[%s1374_s8 + $0x10] sm:$0xff]  ;;  %v376_v18 = vmul.f32 %v1407_v9, %v1407_v9  ;;  %v377_v19 = vmul.f32 %v1409_v10, %v1409_v10  ;;  %s1026_s23 = scalar_lea.vmem %s1588_s1, 32  ;;  %p1683_p0 = scmp.ne.s32.totalorder %s1659_s26, 0 }
  0x9e   : > { %v1427_v17 = vld [vmem:[%s1374_s8 + $0x18] sm:$0xff]  ;;  %v378_v20 = vadd.f32 %v372_v8, %v370_v6  ;;  %v408_v21 = vmul.f32 %v1412_v11, %v1412_v11  ;;  %v1436_v22 = vld [vmem:[%s1374_s8 + $0x20] sm:$0xff]  ;;  %v1439_v23 = vld [vmem:[%s1374_s8 + $0x28] sm:$0xff]  ;;  %v387_v25 = vadd.f32 %v373_v12, %v371_v7  ;;  %v409_v26 = vmul.f32 %v1421_v15, %v1421_v15  ;;  %p1027_p13 = scmp.ne.s32.totalorder %s1588_s1, %s1026_s23  ;;  %s1110_s19 = smov [#allocation10]  }
  0x9f   : > { %v1442_v24 = vld [vmem:[%s1374_s8 + $0x30] sm:$0xff]  ;;  %v410_v27 = vmul.f32 %v1424_v16, %v1424_v16  ;;  %v411_v28 = vmul.f32 %v1427_v17, %v1427_v17  ;;  %v1451_v29 = vld [vmem:[%s1374_s8 + $0x38] sm:$0xff]  ;;  %v1454_v30 = vld [vmem:[%s1380_s24] sm:$0xff]  ;;  %v412_v33 = vmul.f32 %v1436_v22, %v1436_v22  ;;  %v413_v34 = vmul.f32 %v1439_v23, %v1439_v23  ;;  %s1030_s30 = sshll.u32 %s1110_s19, 4  ;;  %s1031_s30 = int_to_ptr.vmem [resolvable:$false] %s1030_s30 }
  0xa0   : > { %v1457_v31 = vld [vmem:[%s1380_s24 + $0x8] sm:$0xff]  ;;  %v379_v32 = vadd.f32 %v378_v20, %v374_v13  ;;  %v414_v35 = vmul.f32 %v1442_v24, %v1442_v24  ;;  %v1466_v36 = vld [vmem:[%s1380_s24 + $0x10] sm:$0xff]  ;;  %v1469_v37 = vld [vmem:[%s1380_s24 + $0x18] sm:$0xff]  ;;  %v388_v39 = vadd.f32 %v387_v25, %v375_v14  ;;  %v415_v40 = vmul.f32 %v1451_v29, %v1451_v29  ;;  %p1028_p5 = pnand %p1027_p13, %p1683_p0  ;;  %s1032_s20 = scalar_lea.vmem %s1031_s30, 64 }
  0xa1   : > { %1673 = vst [vmem:[#allocation19_spill] sm:$0xff] %v1469_v37  ;;  %v1472_v38 = vld [vmem:[%s1380_s24 + $0x20] sm:$0xff]  ;;  %v416_v41 = vadd.f32 %v410_v27, %v408_v21  ;;  %v425_v42 = vadd.f32 %v411_v28, %v409_v26  ;;  %v1477_v43 = vld [vmem:[%s1380_s24 + $0x28] sm:$0xff]  ;;  %v1480_v44 = vld [vmem:[%s1380_s24 + $0x30] sm:$0xff]  ;;  %v446_v47 = vmul.f32 %v1454_v30, %v1454_v30  ;;  %v447_v48 = vmul.f32 %v1457_v31, %v1457_v31  ;;  %p1033_p11 = scmp.lt.s32.totalorder %s1588_s1, %s1031_s30  ;;  %p1034_p1 = scmp.lt.s32.totalorder %s1032_s20, %s1026_s23 }
  0xa2   : > { %1674 = vst [vmem:[#allocation20_spill] sm:$0xff] %v1472_v38  ;;  %1675 = vst [vmem:[#allocation21_spill] sm:$0xff] %v1477_v43  ;;  %v1483_v45 = vld [vmem:[%s1380_s24 + $0x38] sm:$0xff]  ;;  %v380_v46 = vadd.f32 %v379_v32, %v376_v18  ;;  %v448_v49 = vmul.f32 %v1466_v36, %v1466_v36  ;;  %v1492_v50 = vld [vmem:[%s1383_s22] sm:$0xff]  ;;  %v389_v51 = vadd.f32 %v388_v39, %v377_v19  ;;  %p1029_p10 = pneg %p1028_p5 }
  0xa3   : > { %1676 = vst [vmem:[#allocation22_spill] sm:$0xff] %v1480_v44  ;;  %1677 = vst [vmem:[#allocation23_spill] sm:$0xff] %v1483_v45  ;;  %v417_v52 = vadd.f32 %v416_v41, %v412_v33  ;;  %v426_v53 = vadd.f32 %v425_v42, %v413_v34  ;;  %v449_v54 = vmul.f32 %v1469_v37, %v1469_v37  ;;  %v1497_v55 = vld [vmem:[%s1383_s22 + $0x8] sm:$0xff]  ;;  %v1506_v60 = vld [vmem:[%s1383_s22 + $0x10] sm:$0xff]  ;;  %p1035_p4 = por %p1034_p1, %p1033_p11 }
  0xa4   : > { %v381_v56 = vrot.slane %v380_v46, 4  ;;  %v450_v57 = vmul.f32 %v1472_v38, %v1472_v38  ;;  %v451_v58 = vmul.f32 %v1477_v43, %v1477_v43  ;;  %v452_v59 = vmul.f32 %v1480_v44, %v1480_v44  ;;  %v1511_v7 = vld [vmem:[%s1383_s22 + $0x18] sm:$0xff]  ;;  %v1516_v18 = vld [vmem:[%s1383_s22 + $0x20] sm:$0xff]  ;;  %v1521_v26 = vld [vmem:[%s1383_s22 + $0x28] sm:$0xff] }
  0xa5   : > { %v390_v61 = vrot.slane %v389_v51, 4  ;;  %v418_v62 = vadd.f32 %v417_v52, %v414_v35  ;;  %v427_v63 = vadd.f32 %v426_v53, %v415_v40  ;;  %v453_v6 = vmul.f32 %v1483_v45, %v1483_v45  ;;  %v1526_v34 = vld [vmem:[%s1383_s22 + $0x30] sm:$0xff]  ;;  %v1531_v42 = vld [vmem:[%s1383_s22 + $0x38] sm:$0xff]  ;;  %p1036_p7 = pnand %p1035_p4, %p1029_p10 }
  0xa6   : > { %v382_v8 = vadd.f32 %v381_v56, %v380_v46  ;;  %v454_v12 = vadd.f32 %v448_v49, %v446_v47  ;;  %v463_v13 = vadd.f32 %v449_v54, %v447_v48  ;;  %v518_v14 = vmul.f32 %v1492_v50, %v1492_v50 }
  0xa7   : > { %v391_v19 = vadd.f32 %v390_v61, %v389_v51  ;;  %v419_v20 = vrot.slane %v418_v62, 4  ;;  %v428_v21 = vrot.slane %v427_v63, 4  ;;  %v519_v25 = vmul.f32 %v1497_v55, %v1497_v55 }
  0xa8   : > { %v383_v27 = vrot.slane %v382_v8, 2  ;;  %v455_v28 = vadd.f32 %v454_v12, %v450_v57  ;;  %v464_v32 = vadd.f32 %v463_v13, %v451_v58  ;;  %v520_v33 = vmul.f32 %v1506_v60, %v1506_v60 }
  0xa9   : > { %v392_v35 = vrot.slane %v391_v19, 2  ;;  %v420_v39 = vadd.f32 %v419_v20, %v418_v62  ;;  %v429_v40 = vadd.f32 %v428_v21, %v427_v63  ;;  %v521_v41 = vmul.f32 %v1511_v7, %v1511_v7 }
  0xaa   : > { %v384_v46 = vadd.f32 %v383_v27, %v382_v8  ;;  %v456_v47 = vadd.f32 %v455_v28, %v452_v59  ;;  %v465_v48 = vadd.f32 %v464_v32, %v453_v6  ;;  %v522_v49 = vmul.f32 %v1516_v18, %v1516_v18 }
  0xab   : > { %v393_v51 = vadd.f32 %v392_v35, %v391_v19  ;;  %v421_v52 = vrot.slane %v420_v39, 2  ;;  %v430_v53 = vrot.slane %v429_v40, 2  ;;  %v523_v54 = vmul.f32 %v1521_v26, %v1521_v26 }
  0xac   : > { %v385_v56 = vrot.slane %v384_v46, 1  ;;  %v457_v57 = vrot.slane %v456_v47, 4  ;;  %v466_v58 = vrot.slane %v465_v48, 4  ;;  %v524_v61 = vmul.f32 %v1526_v34, %v1526_v34 }
  0xad   : > { %v394_v62 = vrot.slane %v393_v51, 1  ;;  %v422_v63 = vadd.f32 %v421_v52, %v420_v39  ;;  %v431_v8 = vadd.f32 %v430_v53, %v429_v40  ;;  %v525_v59 = vmul.f32 %v1531_v42, %v1531_v42 }
  0xae   : > { %v386_v6 = vadd.f32 %v385_v56, %v384_v46  ;;  %v458_v12 = vadd.f32 %v457_v57, %v456_v47  ;;  %v467_v13 = vadd.f32 %v466_v58, %v465_v48  ;;  %v526_v19 = vadd.f32 %v520_v33, %v518_v14 }
  0xaf   : > { %v395_v20 = vadd.f32 %v394_v62, %v393_v51  ;;  %v423_v21 = vrot.slane %v422_v63, 1  ;;  %v432_v27 = vrot.slane %v431_v8, 1  ;;  %v535_v28 = vadd.f32 %v521_v41, %v519_v25 }
  0xb0   : > { %v396_v32 = vmax.f32 %v386_v6, 1e-24  ;;  %v459_v35 = vrot.slane %v458_v12, 2  ;;  %v468_v45 = vrot.slane %v467_v13, 2  ;;  %v527_v43 = vadd.f32 %v526_v19, %v522_v49 }
  0xb1   : > { %v397_v37 = vmax.f32 %v395_v20, 1e-24  ;;  %v424_v44 = vadd.f32 %v423_v21, %v422_v63  ;;  %v433_v38 = vadd.f32 %v432_v27, %v431_v8  ;;  %v536_v39 = vadd.f32 %v535_v28, %v523_v54 }
  0xb2   : > { %886 = vrsqrt.f32 %v396_v32  ;;  %v528_v40 = vadd.f32 %v527_v43, %v524_v61  ;;  %v460_v14 = vadd.f32 %v459_v35, %v458_v12  ;;  %v469_v33 = vadd.f32 %v468_v45, %v467_v13 }
  0xb3   : > { %888 = vrsqrt.f32 %v397_v37  ;;  %v434_v52 = vmax.f32 %v424_v44, 1e-24  ;;  %v435_v46 = vmax.f32 %v433_v38, 1e-24  ;;  %v537_v47 = vadd.f32 %v536_v39, %v525_v59 }
  0xb4   : > { %v529_v48 = vrot.slane %v528_v40, 4  ;;  %v461_v49 = vrot.slane %v460_v14, 1  ;;  %v470_v56 = vrot.slane %v469_v33, 1 }
  0xb5   : > { %890 = vrsqrt.f32 %v434_v52  ;;  %v538_v51 = vrot.slane %v537_v47, 4 }
  0xb6   : > { %892 = vrsqrt.f32 %v435_v46  ;;  %v530_v25 = vadd.f32 %v529_v48, %v528_v40  ;;  %v462_v43 = vadd.f32 %v461_v49, %v460_v14  ;;  %v471_v37 = vadd.f32 %v470_v56, %v469_v33 }
  0xb7   : > { %v539_v41 = vadd.f32 %v538_v51, %v537_v47 }
  0xb8   : > { %v531_v53 = vrot.slane %v530_v25, 2  ;;  %v473_v35 = vmax.f32 %v471_v37, 1e-24 }
  0xb9   : > { %v540_v57 = vrot.slane %v539_v41, 2 }
  0xba   : > { %v532_v58 = vadd.f32 %v531_v53, %v530_v25 }
  0xbb   : > { %v541_v38 = vadd.f32 %v540_v57, %v539_v41 }
  0xbc   : > { %v887_v54 = vpop.eup %886  ;;  %v533_v44 = vrot.slane %v532_v58, 1 }
  0xbd   : > { %v889_v62 = vpop.eup %888  ;;  %v400_v61 = vmul.f32 %v887_v54, %v1389_v0  ;;  %v402_v63 = vmul.f32 %v887_v54, %v1393_v2  ;;  %v404_v45 = vmul.f32 %v887_v54, %v1397_v4  ;;  %v406_v8 = vmul.f32 %v887_v54, %v1407_v9 }
  0xbe   : > { %v401_v6 = vmul.f32 %v889_v62, %v1391_v1  ;;  %v403_v12 = vmul.f32 %v889_v62, %v1395_v3  ;;  %v405_v13 = vmul.f32 %v889_v62, %v1399_v5  ;;  %v407_v19 = vmul.f32 %v889_v62, %v1409_v10 }
  0xbf   : > { %v891_v59 = vpop.eup %890  ;;  %v472_v5 = vmax.f32 %v462_v43, 1e-24 }
  0xc0   : > { %v893_v20 = vpop.eup %892  ;;  %v438_v21 = vmul.f32 %v891_v59, %v1412_v11  ;;  %v440_v0 = vmul.f32 %v891_v59, %v1424_v16  ;;  %v442_v2 = vmul.f32 %v891_v59, %v1436_v22  ;;  %v444_v4 = vmul.f32 %v891_v59, %v1442_v24 }
  0xc1   : > { %v439_v9 = vmul.f32 %v893_v20, %v1421_v15  ;;  %v441_v27 = vmul.f32 %v893_v20, %v1427_v17  ;;  %v443_v1 = vmul.f32 %v893_v20, %v1439_v23  ;;  %v445_v3 = vmul.f32 %v893_v20, %v1451_v29  ;;  %v1679_v20 = vld [vmem:[#allocation22_spill] sm:$0xff] }
  0xc2   : > { %v484_v28 = vsub.f32 %v400_v61, %v438_v21  ;;  %v486_v10 = vsub.f32 %v402_v63, %v440_v0  ;;  %v488_v32 = vsub.f32 %v404_v45, %v442_v2  ;;  %v490_v40 = vsub.f32 %v406_v8, %v444_v4  ;;  %v1680_v4 = vld [vmem:[#allocation19_spill] sm:$0xff] }
  0xc3   : > { %v485_v11 = vsub.f32 %v401_v6, %v439_v9  ;;  %v487_v39 = vsub.f32 %v403_v12, %v441_v27  ;;  %v489_v16 = vsub.f32 %v405_v13, %v443_v1  ;;  %v542_v15 = vrot.slane %v541_v38, 1  ;;  %v1678_v13 = vld [vmem:[#allocation20_spill] sm:$0xff]  ;;  %v1681_v27 = vld [vmem:[#allocation21_spill] sm:$0xff] }
  0xc4   : > { %v492_v22 = vmul.f32 %v484_v28, %v1492_v50  ;;  %v494_v24 = vmul.f32 %v486_v10, %v1506_v60  ;;  %v491_v52 = vsub.f32 %v407_v19, %v445_v3  ;;  %v534_v17 = vadd.f32 %v533_v44, %v532_v58  ;;  %v1682_v3 = vld [vmem:[#allocation23_spill] sm:$0xff] }
  0xc5   : > { %v496_v23 = vmul.f32 %v488_v32, %v1516_v18  ;;  %894 = vrsqrt.f32 %v472_v5  ;;  %v493_v29 = vmul.f32 %v485_v11, %v1497_v55  ;;  %v495_v46 = vmul.f32 %v487_v39, %v1511_v7 }
  0xc6   : > { %v497_v47 = vmul.f32 %v489_v16, %v1521_v26  ;;  %896 = vrsqrt.f32 %v473_v35  ;;  %v498_v48 = vmul.f32 %v490_v40, %v1526_v34  ;;  %v500_v14 = vadd.f32 %v494_v24, %v492_v22 }
  0xc7   : > { %v543_v33 = vadd.f32 %v542_v15, %v541_v38  ;;  %v499_v51 = vmul.f32 %v491_v52, %v1531_v42  ;;  %v509_v25 = vadd.f32 %v495_v46, %v493_v29  ;;  %v544_v41 = vmax.f32 %v534_v17, 1e-24 }
  0xc8   : > { %v501_v53 = vadd.f32 %v500_v14, %v496_v23 }
  0xc9   : > { %v545_v49 = vmax.f32 %v543_v33, 1e-24  ;;  %v510_v56 = vadd.f32 %v509_v25, %v497_v47  ;;  %898 = vrcp.f32 %v544_v41 }
  0xca   : > { %v502_v57 = vadd.f32 %v501_v53, %v498_v48 }
  0xcb   : > { %v511_v58 = vadd.f32 %v510_v56, %v499_v51  ;;  %900 = vrcp.f32 %v545_v49 }
  0xcc   : > { %v503_v54 = vrot.slane %v502_v57, 4 }
  0xcd   : > { %v512_v62 = vrot.slane %v511_v58, 4 }
  0xce   : > { %v504_v43 = vadd.f32 %v503_v54, %v502_v57 }
  0xcf   : > { %v895_v37 = vpop.eup %894  ;;  %v513_v44 = vadd.f32 %v512_v62, %v511_v58 }
  0xd0   : > { %v897_v61 = vpop.eup %896  ;;  %v505_v63 = vrot.slane %v504_v43, 2  ;;  %v476_v8 = vmul.f32 %v895_v37, %v1454_v30  ;;  %v478_v12 = vmul.f32 %v895_v37, %v1466_v36  ;;  %v480_v19 = vmul.f32 %v895_v37, %v1678_v13 }
  0xd1   : > { %v514_v45 = vrot.slane %v513_v44, 2  ;;  %v477_v59 = vmul.f32 %v897_v61, %v1457_v31  ;;  %v482_v21 = vmul.f32 %v895_v37, %v1679_v20  ;;  %v479_v9 = vmul.f32 %v897_v61, %v1680_v4 }
  0xd2   : > { %v506_v38 = vadd.f32 %v505_v63, %v504_v43  ;;  %v481_v1 = vmul.f32 %v897_v61, %v1681_v27  ;;  %v483_v5 = vmul.f32 %v897_v61, %v1682_v3  ;;  %v550_v31 = vadd.f32 %v484_v28, %v476_v8 }
  0xd3   : > { %v515_v6 = vadd.f32 %v514_v45, %v513_v44  ;;  %v899_v2 = vpop.eup %898  ;;  %v551_v15 = vadd.f32 %v485_v11, %v477_v59  ;;  %v552_v36 = vadd.f32 %v486_v10, %v478_v12  ;;  %v554_v23 = vadd.f32 %v488_v32, %v480_v19 }
  0xd4   : > { %v507_v0 = vrot.slane %v506_v38, 1  ;;  %v556_v29 = vadd.f32 %v490_v40, %v482_v21  ;;  %v553_v47 = vadd.f32 %v487_v39, %v479_v9  ;;  %v555_v48 = vadd.f32 %v489_v16, %v481_v1 }
  0xd5   : > { %v516_v35 = vrot.slane %v515_v6, 1  ;;  %v901_v22 = vpop.eup %900  ;;  %v557_v14 = vadd.f32 %v491_v52, %v483_v5  ;;  %v622_v4 = vlaneseq }
  0xd6   : > { %v508_v30 = vadd.f32 %v507_v0, %v506_v38  ;;  %v1109_v0 = vmov 1966171168  }
  0xd7   : > { %v517_v24 = vadd.f32 %v516_v35, %v515_v6  ;;  %vm636_vm4 = vcmp.lt.s32.totalorder %v622_v4, 256 }
  0xd8   : > { %v547_v17 = vmul.f32 %v899_v2, %v508_v30  ;;  %v620_v2 = vunpack.c.l.s4 %v1109_v0  ;;  %v623_v30 = vshrl.u32 %v622_v4, 7 }
  0xd9   : > { %v549_v46 = vmul.f32 %v901_v22, %v517_v24 }
  0xda   : > { %v558_v33 = vmul.f32 %v547_v17, %v1492_v50  ;;  %v560_v51 = vmul.f32 %v547_v17, %v1506_v60  ;;  %v562_v25 = vmul.f32 %v547_v17, %v1516_v18  ;;  %v564_v41 = vmul.f32 %v547_v17, %v1526_v34 }
  0xdb   : > { %v559_v53 = vmul.f32 %v549_v46, %v1497_v55  ;;  %v561_v28 = vmul.f32 %v549_v46, %v1511_v7  ;;  %v563_v10 = vmul.f32 %v549_v46, %v1521_v26  ;;  %v565_v32 = vmul.f32 %v549_v46, %v1531_v42 }
  0xdc   : > { %v566_v11 = vsub.f32 %v550_v31, %v558_v33  ;;  %v568_v39 = vsub.f32 %v552_v36, %v560_v51  ;;  %v570_v16 = vsub.f32 %v554_v23, %v562_v25  ;;  %v572_v40 = vsub.f32 %v556_v29, %v564_v41 }
  0xdd   : > { %v567_v52 = vsub.f32 %v551_v15, %v559_v53  ;;  %v569_v50 = vsub.f32 %v553_v47, %v561_v28  ;;  %v571_v49 = vsub.f32 %v555_v48, %v563_v10  ;;  %v573_v60 = vsub.f32 %v557_v14, %v565_v32 }
  0xde   : > { %v574_v56 = vmul.f32 %v566_v11, %v566_v11  ;;  %v576_v18 = vmul.f32 %v568_v39, %v568_v39  ;;  %v578_v57 = vmul.f32 %v570_v16, %v570_v16  ;;  %v580_v54 = vmul.f32 %v572_v40, %v572_v40 }
  0xdf   : > { %v575_v34 = vmul.f32 %v567_v52, %v567_v52  ;;  %v577_v58 = vmul.f32 %v569_v50, %v569_v50  ;;  %v579_v55 = vmul.f32 %v571_v49, %v571_v49  ;;  %v581_v62 = vmul.f32 %v573_v60, %v573_v60 }
  0xe0   : > { %v582_v7 = vadd.f32 %v576_v18, %v574_v56  ;;  %v621_v22 = vunpack.c.0.s8 %v620_v2 }
  0xe1   : > { %v591_v26 = vadd.f32 %v577_v58, %v575_v34 }
  0xe2   : > { %v583_v43 = vadd.f32 %v582_v7, %v578_v57  ;;  %v624_v29 = vsub.s32 %v621_v22, %v623_v30 }
  0xe3   : > { %v592_v42 = vadd.f32 %v591_v26, %v579_v55 }
  0xe4   : > { %v584_v37 = vadd.f32 %v583_v43, %v580_v54 }
  0xe5   : > { %v593_v44 = vadd.f32 %v592_v42, %v581_v62 }
  0xe6   : > { %v585_v61 = vrot.slane %v584_v37, 4 }
  0xe7   : > { %v594_v63 = vrot.slane %v593_v44, 4 }
  0xe8   : > { %v586_v45 = vadd.f32 %v585_v61, %v584_v37 }
  0xe9   : > { %v595_v38 = vadd.f32 %v594_v63, %v593_v44 }
  0xea   : > { %v587_v8 = vrot.slane %v586_v45, 2 }
  0xeb   : > { %v596_v59 = vrot.slane %v595_v38, 2 }
  0xec   : > { %v588_v6 = vadd.f32 %v587_v8, %v586_v45 }
  0xed   : > { %v597_v12 = vadd.f32 %v596_v59, %v595_v38 }
  0xee   : > { %v589_v13 = vrot.slane %v588_v6, 1 }
  0xef   : > { %v598_v19 = vrot.slane %v597_v12, 1 }
  0xf0   : > { %v590_v20 = vadd.f32 %v589_v13, %v588_v6 }
  0xf1   : > { %v599_v21 = vadd.f32 %v598_v19, %v597_v12 }
  0xf2   : > { %902 = vrsqrt.f32 %v590_v20  ;;  %vm602_vm0 = vcmp.eq.f32.partialorder %v590_v20, inf  ;;  %v605_v27 = vand.u32 2147483648, %v590_v20  ;;  %vm604_vm1 = vcmp.eq.f32.partialorder %v590_v20, 0.0 }
  0xf3   : > { %904 = vrsqrt.f32 %v599_v21  ;;  %vm609_vm2 = vcmp.eq.f32.partialorder %v599_v21, inf  ;;  %v612_v5 = vand.u32 2147483648, %v599_v21  ;;  %vm611_vm3 = vcmp.eq.f32.partialorder %v599_v21, 0.0 }
  0xfc   : > { %v903_v9 = vpop.eup %902 }
  0xfd   : > { %v905_v1 = vpop.eup %904  ;;  %v601_v3 = vmul.f32 %v903_v9, %v590_v20 }
  0xfe   : > { %v608_v35 = vmul.f32 %v905_v1, %v599_v21 }
  0xff   : > { %v603_v24 = vsel %vm602_vm0, %v590_v20, %v601_v3 }
 0x100   : > { %v606_v31 = vsel %vm604_vm1, %v605_v27, %v603_v24  ;;  %v610_v15 = vsel %vm609_vm2, %v599_v21, %v608_v35 }
 0x101   : > { %v613_v17 = vsel %vm611_vm3, %v612_v5, %v610_v15  ;;  %v614_v36 = vsub.f32 0.0, %v606_v31 }
 0x102   : > { %v615_v23 = vsub.f32 0.0, %v613_v17 }
 0x104   : > { %v618_v46 = vcombine.low %v614_v36, %v615_v23 }
 0x106   : > { %v625_v47 = vrot.slane %v618_v46, %v624_v29 }
 0x108   : > { %v632_v48 = vrot.slane %v625_v47, %v624_v29 }
 0x10a   : > { %638 = vst.msk [vmem:[%s332_s17] sm:$0x3] %vm636_vm4, %v632_v48 }
 0x10b   : > { %1039 = shalt.err (!%p1036_p7)
}
 0x10c   : > { %s1040_s0 = scalar_lea.hbm %s1586_s10, 32  ;;  %s1044_s6 = scalar_lea.hbm %s1634_s4, 64 }
 0x10d   : > { %p1041_p2 = scmp.ne.s32.totalorder %s1586_s10, %s1040_s0  ;;  %p1045_p12 = scmp.lt.u32.totalorder %s1586_s10, %s1634_s4 }
 0x10e   : > { %p1046_p3 = scmp.lt.u32.totalorder %s1044_s6, %s1040_s0  ;;  %p1048_p13 = scmp.lt.u32.totalorder %s1040_s0, %s1586_s10 }
 0x10f   : > { %p1042_p8 = pnand %p1041_p2, %p1683_p0 }
 0x110   : > { %p1047_p6 = por %p1046_p3, %p1045_p12 }
 0x111   : > { %p1043_p9 = pneg %p1042_p8 }
 0x112   : > { %p1049_p5 = por %p1048_p13, %p1047_p6 }
 0x114   : > { %p1050_p10 = pnand %p1049_p5, %p1043_p9 }
 0x116   : > { %1053 = shalt.err (!%p1050_p10)
}
 0x117   : > { %829 = dma.vmem_to_hbm [thread:$0]  (%p1683_p0), %s1588_s1, 32, %s1586_s10, %s640_s29  }
 0x118 PF: > { %s1684_s28 = sld [smem:[#allocation16_spill]]  ;;  %s666_s21 = sand.u32 1, %s1088_s15  }
 0x119   : > { %p1685_p11 = scmp.ne.s32.totalorder %s1660_s27, 0  ;;  %s667_s8 = scalar_lea.sflag [#allocation4], %s666_s21 }
 0x11e   : > { %p1686_p1 = scmp.ge.s32.totalorder %s1684_s28, 2 }
 0x120   : > { %p845_p4 = pnand %p1686_p1, %p1685_p11 }
 0x122   : > { %1083 = dma.done.wait (!%p845_p4), %s667_s8, 32  }
 0x123   : > { %1085 = vsyncadd (!%p845_p4), %s667_s8, 4294967264  ;;  %s1687_s18 = sld [smem:[#allocation17_spill]]  ;;  %s1688_s24 = sld [smem:[#allocation15_spill]] }
 0x124   : > { %s1689_s17 = sld [smem:[#allocation18_spill]]  ;;  %s1690_s15 = smov %s1092_s16 }
 0x129   : > { %p23_p7 = scmp.ge.s32.totalorder %s1687_s18, 4   ;;  %s1691_s16 = smov %s1688_s24 }
 0x12b   :  { %25 = sbr.rel (!%p23_p7) target bundleno = 12 (0xc), region = 118 }
 0x132   :  { %672 = vsyncpa [#allocation3], 1 }
 0x133   :  { %674 = vsyncpa [#allocation3 + $0x1], 1 }
 0x134   :  { %675 = vsyncpa [#allocation6], 1 }
 0x135   :  { %677 = vsyncpa [#allocation6 + $0x1], 1 }
 0x136   :  { %678 = vsyncpa [#allocation9], 1 }
 0x137   :  { %680 = vsyncpa [#allocation9 + $0x1], 1 }
 0x138   :  { %681 = vsyncpa [#allocation4], 1 }
 0x139   :  { %683 = vsyncpa [#allocation4 + $0x1], 1 }

</bundles_post_ra>
